<compile_context>
chip_gen: v6e
topology: v6e:2x2x1
jax: 0.10.0
libtpu: 0.0.40
codegen_flags: <defaults>
</compile_context>

<pallas_src>
import functools
import math

import jax
import jax.numpy as jnp
from jax.experimental import pallas as pl
from jax.experimental.pallas import tpu as pltpu

_LN2 = math.log(2.0)


def _ssp(h):
    # shifted softplus: softplus(h) - ln 2 (exp / log1p run on the idle EUP slot)
    return jnp.maximum(h, 0.0) + jnp.log1p(jnp.exp(-jnp.abs(h))) - _LN2


def _round_up(v, m):
    return ((v + m - 1) // m) * m


# ---------------------------------------------------------------------------
# lin1: x_i = x @ W1 + b1, node-tile parallel (hoisted out of the edge loop).
# ---------------------------------------------------------------------------
def _lin1_kernel(x_ref, w_ref, b_ref, o_ref):
    o_ref[...] = (jnp.dot(x_ref[...], w_ref[...], preferred_element_type=jnp.float32)
                  + b_ref[...])


# ---------------------------------------------------------------------------
# Fused cfconv: filter MLP + gather + message + scatter-add + lin2.
# grid = (node_tiles, edge_tiles); the edge axis is the reduction axis and the
# per-node-tile [tN, Fp] f32 accumulator lives in VMEM scratch (P3 pattern).
# ---------------------------------------------------------------------------
def _cfconv_kernel(gather_mode, row_ref, col_ref, ea_ref, xi_ref,
                   mw0_ref, mb0_ref, mw1_ref, mb1_ref, w2_ref, b2_ref,
                   out_ref, acc_ref):
    f32, bf16 = jnp.float32, jnp.bfloat16
    e = pl.program_id(1)
    tN = acc_ref.shape[0]
    tE = ea_ref.shape[0]
    Np, Fp = xi_ref.shape
    n_base = pl.program_id(0) * tN

    @pl.when(e == 0)
    def _init():
        acc_ref[...] = jnp.zeros_like(acc_ref)

    # Filter-generating MLP on this edge tile: bf16 MXU inputs, f32 accumulate,
    # f32 bias + shifted softplus.
    h = (jnp.dot(ea_ref[...].astype(bf16), mw0_ref[...], preferred_element_type=f32)
         + mb0_ref[...])
    h = _ssp(h)
    ew = (jnp.dot(h.astype(bf16), mw1_ref[...], preferred_element_type=f32)
          + mb1_ref[...])
    ew = _ssp(ew)                                             # [tE, Fp] f32

    x_i = xi_ref[...]                                         # [Np, Fp] f32 resident
    if gather_mode == "take":
        # Bounded O(tE*Fp) row gather from the resident x_i. Padded edges carry
        # col == 0 (in bounds); their row == -1 keeps them out of the scatter.
        idx = jnp.broadcast_to(col_ref[...], (tE, Fp))        # (tE,1) -> (tE,Fp)
        x_g = jnp.take_along_axis(x_i, idx, axis=0)           # [tE, Fp] f32
    else:
        # Fallback: one-hot gather on the MXU (O(tE*Np*Fp), node-count scaled).
        col_iota = jax.lax.broadcasted_iota(jnp.int32, (tE, Np), 1)
        g_oh = (col_ref[...] == col_iota).astype(bf16)        # [tE, Np]
        x_g = jnp.dot(g_oh, x_i.astype(bf16), preferred_element_type=f32)

    x_j = (x_g * ew).astype(bf16)                             # single bf16 rounding

    # Scatter-add over `row`: pre-transposed one-hot MXU contraction; only a
    # [tN,1] iota is built and broadcast against the lane-dense [1,tE] row block.
    node_ids = jax.lax.broadcasted_iota(jnp.int32, (tN, 1), 0) + n_base
    scat_t = (row_ref[...] == node_ids).astype(bf16)          # [tN, tE]
    acc_ref[...] += jnp.dot(scat_t, x_j, preferred_element_type=f32)

    @pl.when(e == pl.num_programs(1) - 1)
    def _finish():
        # lin2 fused with the lane-dense [tN, Hp] output store.
        out_ref[...] = (jnp.dot(acc_ref[...], w2_ref[...], preferred_element_type=f32)
                        + b2_ref[...])


def continuous_filter_conv(x, edge_index, edge_attr, params, *,
                           edge_tile=512, node_tile=256):
    """x: [N, H] f32, edge_index: [2, E] int, edge_attr: [E, G] f32 -> [N, H] f32."""
    f32, bf16 = jnp.float32, jnp.bfloat16
    N, H = x.shape
    E, G = edge_attr.shape
    F = params["w1"].shape[1]

    # Lane-dense feature dims; (8,128)-friendly node / edge padding.
    Hp = _round_up(H, 128)
    Fp = _round_up(F, 128)

    Np0 = _round_up(N, 8)
    tN = min(node_tile, Np0)
    if Np0 > 8:                        # >= 2 node tiles so v7x's 2nd TC gets work
        tN = min(tN, _round_up((Np0 + 1) // 2, 8))
    Np = _round_up(Np0, tN)

    Ep0 = _round_up(E, 8)
    if Ep0 <= edge_tile:
        tE, Ep = Ep0, Ep0
    else:
        tE = _round_up(min(edge_tile, Ep0), 128)
        Ep = _round_up(Ep0, tE)

    def pad2(a, r, c, dtype=f32):
        a = a.astype(f32)
        return jnp.pad(a, ((0, r - a.shape[0]), (0, c - a.shape[1]))).astype(dtype)

    x_p = pad2(x, Np, Hp)
    ea_p = pad2(edge_attr, Ep, G)
    w1 = pad2(params["w1"], Hp, Fp); b1 = pad2(params["b1"], 1, Fp)
    mw0 = pad2(params["mw0"], G, Fp, bf16); mb0 = pad2(params["mb0"], 1, Fp)
    mw1 = pad2(params["mw1"], Fp, Fp, bf16); mb1 = pad2(params["mb1"], 1, Fp)
    w2 = pad2(params["w2"], Fp, Hp); b2 = pad2(params["b2"], 1, Hp)

    # row: lane-dense [1, Ep]; padded edges -> -1 so the scatter never matches.
    # col: [Ep, 1]; padded edges -> 0 (in-bounds; neutralized by the row sentinel).
    row = jnp.full((1, Ep), -1, jnp.int32).at[0, :E].set(edge_index[0].astype(jnp.int32))
    col = jnp.zeros((Ep, 1), jnp.int32).at[:E, 0].set(edge_index[1].astype(jnp.int32))

    # ---- lin1 hoisted out of the edge loop (runs once, node-parallel) ----
    x_i = pl.pallas_call(
        _lin1_kernel,
        out_shape=jax.ShapeDtypeStruct((Np, Fp), f32),
        grid_spec=pltpu.PrefetchScalarGridSpec(
            num_scalar_prefetch=0,
            grid=(Np // tN,),
            in_specs=[pl.BlockSpec((tN, Hp), lambda i: (i, 0)),
                      pl.BlockSpec((Hp, Fp), lambda i: (0, 0)),
                      pl.BlockSpec((1, Fp), lambda i: (0, 0))],
            out_specs=pl.BlockSpec((tN, Fp), lambda i: (i, 0))),
        compiler_params=pltpu.CompilerParams(dimension_semantics=("parallel",)),
    )(x_p, w1, b1)

    # ---- fused cfconv ----
    const = lambda i, e: (0, 0)

    def build(gather_mode, single_buffer):
        def const_spec(shape):
            if single_buffer:   # constant blocks need no double buffering
                return pl.BlockSpec(shape, const, pipeline_mode=pl.Buffered(1))
            return pl.BlockSpec(shape, const)

        in_specs = [
            pl.BlockSpec((1, tE), lambda i, e: (0, e)),     # row
            pl.BlockSpec((tE, 1), lambda i, e: (e, 0)),     # col
            pl.BlockSpec((tE, G), lambda i, e: (e, 0)),     # edge_attr (streamed)
            const_spec((Np, Fp)),                           # x_i (resident, f32)
            const_spec((G, Fp)), const_spec((1, Fp)),       # mlp[0]  (bf16 W)
            const_spec((Fp, Fp)), const_spec((1, Fp)),      # mlp[1]  (bf16 W)
            const_spec((Fp, Hp)), const_spec((1, Hp)),      # lin2    (f32 W)
        ]
        return pl.pallas_call(
            functools.partial(_cfconv_kernel, gather_mode),
            out_shape=jax.ShapeDtypeStruct((Np, Hp), f32),
            grid_spec=pltpu.PrefetchScalarGridSpec(
                num_scalar_prefetch=0,
                grid=(Np // tN, Ep // tE),
                in_specs=in_specs,
                out_specs=pl.BlockSpec((tN, Hp), lambda i, e: (i, 0)),
                scratch_shapes=[pltpu.VMEM((tN, Fp), f32)]),   # scatter accumulator
            compiler_params=pltpu.CompilerParams(
                dimension_semantics=("parallel", "arbitrary"),
                vmem_limit_bytes=48 * 1024 * 1024,   # fits v7x's 64 MiB; safe on v5e/v6e
            ),
        )(row, col, ea_p, x_i, mw0, mb0, mw1, mb1, w2, b2)

    # Preferred config first; degrade gracefully if a pattern fails to lower on
    # this jax/libtpu version (last fallback == the previously validated kernel).
    configs = (("take", True), ("take", False), ("one_hot", True), ("one_hot", False))
    last_err = None
    for gather_mode, single_buffer in configs:
        try:
            out_p = jax.block_until_ready(build(gather_mode, single_buffer))
            return out_p[:N, :H]
        except Exception as err:   # noqa: BLE001 - lowering / compile failures only
            last_err = err
    raise last_err


def xavier_uniform(key, fan_in, fan_out):
    bound = math.sqrt(6.0 / (fan_in + fan_out))
    # stored as [in, out] so the kernels compute act @ W
    return jax.random.uniform(key, (fan_in, fan_out), jnp.float32, -bound, bound)


def init_params(key, hidden_channels, num_gaussians, num_filters):
    k1, k2, k3, k4 = jax.random.split(key, 4)
    return {
        "w1": xavier_uniform(k1, hidden_channels, num_filters),
        "b1": jnp.zeros((1, num_filters), jnp.float32),
        "mw0": xavier_uniform(k2, num_gaussians, num_filters),
        "mb0": jnp.zeros((1, num_filters), jnp.float32),
        "mw1": xavier_uniform(k3, num_filters, num_filters),
        "mb1": jnp.zeros((1, num_filters), jnp.float32),
        "w2": xavier_uniform(k4, num_filters, hidden_channels),
        "b2": jnp.zeros((1, hidden_channels), jnp.float32),
    }


def reference_jax(x, edge_index, edge_attr, params):
    """Pure-JAX (f32) reference mirroring the PyTorch forward exactly."""
    row, col = edge_index[0], edge_index[1]
    x_i = x @ params["w1"] + params["b1"]
    h = _ssp(edge_attr @ params["mw0"] + params["mb0"])
    ew = _ssp(h @ params["mw1"] + params["mb1"])
    x_j = x_i[col] * ew
    out = jax.ops.segment_sum(x_j, row, num_segments=x.shape[0])
    return out @ params["w2"] + params["b2"]


if __name__ == "__main__":
    hidden_channels = 32
    num_gaussians = 16
    num_filters = 16
    N = 8      # nodes
    E = 32     # edges

    key = jax.random.PRNGKey(0)
    kp, kx, ke, kr, kc = jax.random.split(key, 5)

    params = init_params(kp, hidden_channels, num_gaussians, num_filters)
    x = jax.random.normal(kx, (N, hidden_channels), jnp.float32)
    edge_attr = jax.random.normal(ke, (E, num_gaussians), jnp.float32)
    row = jax.random.randint(kr, (E,), 0, N, jnp.int32)
    col = jax.random.randint(kc, (E,), 0, N, jnp.int32)
    edge_index = jnp.stack([row, col], axis=0)

    out = continuous_filter_conv(x, edge_index, edge_attr, params)
    out = jax.block_until_ready(out)

    ref = reference_jax(x, edge_index, edge_attr, params)
    assert out.shape == (N, hidden_channels)
    # bf16 MLP matmuls + single bf16 rounding of x_j (f32 accumulation) -> loose tol
    max_err = jnp.max(jnp.abs(out - ref))
    assert jnp.allclose(out, ref, atol=5e-2, rtol=5e-2), f"max abs err {max_err}"

    print("KERNEL_OK")
</pallas_src>

<mosaic_0001>
module attributes {stable_mosaic.version = 11 : i64} {
  func.func @_lin1_kernel(%arg0: i32, %arg1: memref<8x128xf32, #tpu.memory_space<vmem>>, %arg2: memref<128x128xf32, #tpu.memory_space<vmem>>, %arg3: memref<1x128xf32, #tpu.memory_space<vmem>>, %arg4: memref<8x128xf32, #tpu.memory_space<vmem>>) attributes {dimension_semantics = [#tpu.dimension_semantics<parallel>], iteration_bounds = array<i64: 1>, scalar_prefetch = 0 : i64, scratch_operands = 0 : i64, tpu.core_type = #tpu.core_type<tc>, window_params = [{transform_indices = @transform_0, window_bounds = array<i64: 8, 128>}, {pipeline_mode = #tpu.pipeline_mode<synchronous>, transform_indices = @transform_1, window_bounds = array<i64: 128, 128>}, {pipeline_mode = #tpu.pipeline_mode<synchronous>, transform_indices = @transform_2, window_bounds = array<i64: 1, 128>}, {transform_indices = @transform_3, window_bounds = array<i64: 8, 128>}]} {
    %c0 = arith.constant 0 : index
    %c0_0 = arith.constant 0 : index
    %0 = vector.load %arg1[%c0, %c0_0] : memref<8x128xf32, #tpu.memory_space<vmem>>, vector<8x128xf32>
    %c0_1 = arith.constant 0 : index
    %c0_2 = arith.constant 0 : index
    %1 = vector.load %arg2[%c0_1, %c0_2] : memref<128x128xf32, #tpu.memory_space<vmem>>, vector<128x128xf32>
    %cst = arith.constant dense<0.000000e+00> : vector<8x128xf32>
    %2 = tpu.matmul %0, %1, %cst {dimension_numbers = #tpu.dot_dimension_numbers<[1], [0], [0], [1], [0, 0, 1, 1], [], []>} : vector<8x128xf32>, vector<128x128xf32>, vector<8x128xf32> -> vector<8x128xf32>
    %c0_3 = arith.constant 0 : index
    %c0_4 = arith.constant 0 : index
    %3 = vector.load %arg3[%c0_3, %c0_4] : memref<1x128xf32, #tpu.memory_space<vmem>>, vector<1x128xf32>
    %4 = vector.broadcast %3 : vector<1x128xf32> to vector<8x128xf32>
    %5 = arith.addf %2, %4 : vector<8x128xf32>
    %c0_5 = arith.constant 0 : index
    %c0_6 = arith.constant 0 : index
    %6 = vector.load %arg4[%c0_5, %c0_6] : memref<8x128xf32, #tpu.memory_space<vmem>>, vector<8x128xf32>
    tpu.vector_store %arg4[%c0_5, %c0_6], %5 {strides = array<i32>} : memref<8x128xf32, #tpu.memory_space<vmem>>, vector<8x128xf32>,
    return
  }
  func.func @transform_0(%arg0: i32) -> (i32, i32) {
    %c0_i32 = arith.constant 0 : i32
    %c0_i32_0 = arith.constant 0 : i32
    return %arg0, %c0_i32 : i32, i32
  }
  func.func @transform_1(%arg0: i32) -> (i32, i32) {
    %c0_i32 = arith.constant 0 : i32
    %c0_i32_0 = arith.constant 0 : i32
    %c0_i32_1 = arith.constant 0 : i32
    return %c0_i32, %c0_i32_0 : i32, i32
  }
  func.func @transform_2(%arg0: i32) -> (i32, i32) {
    %c0_i32 = arith.constant 0 : i32
    %c0_i32_0 = arith.constant 0 : i32
    %c0_i32_1 = arith.constant 0 : i32
    return %c0_i32, %c0_i32_0 : i32, i32
  }
  func.func @transform_3(%arg0: i32) -> (i32, i32) {
    %c0_i32 = arith.constant 0 : i32
    %c0_i32_0 = arith.constant 0 : i32
    return %arg0, %c0_i32 : i32, i32
  }
}

</mosaic_0001>

<bundles_post_ra>
// kernel: tpu_custom_call.1
= control target key start
LH: loop header
LB: loop body
LE: loop exit
PB: predicated region body
PF: predicated region fallthrough
CT: control target
= control target key end

     0   :  { %8 = vsyncpa [#allocation3], 0  ;;  %s317_s0 = inlined_call_operand.hbm [shape: f32[8,128], index: 0, kind: input, shape index: {}]   ;;  %s318_s1 = inlined_call_operand.hbm [shape: f32[128,128], index: 1, kind: input, shape index: {}]   ;;  %s319_s2 = inlined_call_operand.vmem [shape: f32[1,128], index: 2, kind: input, shape index: {}]   ;;  %s320_s3 = inlined_call_operand.hbm [shape: f32[8,128], index: 3, kind: output, shape index: {}]  }
   0x1   :  { %9 = vsyncpa [#allocation6], 0 }
   0x2   :  { %10 = vsyncpa [#allocation4], 0  ;;  %s278_s12 = smov [#allocation2]   ;;  %s279_s14 = smov [#allocation5]  }
   0x3   :  { %s17_s13 = sshll.u32 %s278_s12, 4  ;;  %s26_s15 = sshll.u32 %s279_s14, 4  ;;  %s18_s13 = int_to_ptr.vmem [resolvable:$true] %s17_s13  ;;  %s27_s15 = int_to_ptr.vmem [resolvable:$true] %s26_s15 }
   0x4   :  { %s220_s16 = scalar_lea.vmem %s18_s13, 128  ;;  %p225_p1 = scmp.lt.s32.totalorder %s18_s13, %s18_s13 }
   0x5   :  { %p221_p0 = scmp.ne.s32.totalorder %s18_s13, %s220_s16  ;;  %p226_p2 = scmp.lt.s32.totalorder %s220_s16, %s220_s16 }
   0x7   :  { %p227_p3 = por %p226_p2, %p225_p1 }
   0x9   :  { %p228_p4 = pnand %p227_p3, %p221_p0 }
   0xb   :  { %231 = shalt.err (!%p228_p4)
}
   0xc   :  { %20 = dma.hbm_to_vmem [thread:$0]  %s317_s0, 128, %s18_s13, [#allocation3]  }
   0xd   :  { %s240_s19 = scalar_lea.vmem %s27_s15, 2048  ;;  %p245_p6 = scmp.lt.s32.totalorder %s27_s15, %s27_s15 }
   0xe   :  { %p241_p5 = scmp.ne.s32.totalorder %s27_s15, %s240_s19  ;;  %p246_p7 = scmp.lt.s32.totalorder %s240_s19, %s240_s19 }
  0x10   :  { %p247_p8 = por %p246_p7, %p245_p6 }
  0x12   :  { %p248_p9 = pnand %p247_p8, %p241_p5 }
  0x14   :  { %251 = shalt.err (!%p248_p9)
}
  0x15   :  { %s280_s20 = smov 128   ;;  %s281_s21 = smov 8  }
  0x16   :  { %32 = dma.hbm_to_vmem [thread:$0]  %s318_s1, 2048, %s27_s15, [#allocation6], %s280_s20, %s280_s20, %s281_s21  }
  0x17   :  { %272 = dma.done.wait [#allocation3], 128  }
  0x18   :  { %273 = vsyncadd [#allocation3], 4294967168 }
  0x19   :  { %274 = dma.done.wait [#allocation6], 2048  }
  0x1a   :  { %275 = vsyncadd [#allocation6], 4294965248  ;;  %v282_v0 = vmov 0.0   ;;  %vm283_vm0 = vmmov 0   ;;  %v57_v1 = vld [vmem:[#allocation5 + $0x78] sm:$0xff]  ;;  %v56_v2 = vld [vmem:[#allocation5 + $0x70] sm:$0xff] }
  0x1b   :  { %170 = vmatprep.subr.mxu0 %v282_v0  ;;  %202 = vmatprep.mubr.msk.f32.mxu0 %vm283_vm0, %v282_v0  ;;  %v55_v3 = vld [vmem:[#allocation5 + $0x68] sm:$0xff]  ;;  %v54_v4 = vld [vmem:[#allocation5 + $0x60] sm:$0xff]  ;;  %v53_v5 = vld [vmem:[#allocation5 + $0x58] sm:$0xff]  ;;  %s284_s24 = smov [#allocation7]  }
  0x1c   :  { %171 = vmatpush3.msra.mxu0 %v57_v1  ;;  %v52_v6 = vld [vmem:[#allocation5 + $0x50] sm:$0xff]  ;;  %v51_v7 = vld [vmem:[#allocation5 + $0x48] sm:$0xff]  ;;  %v50_v8 = vld [vmem:[#allocation5 + $0x40] sm:$0xff]  ;;  %s142_s25 = sshll.u32 %s284_s24, 4  ;;  %s143_s25 = int_to_ptr.vmem [resolvable:$true] %s142_s25 }
  0x1d   :  { %172 = vmatprep.subr.mxu0 %v282_v0  ;;  %v49_v9 = vld [vmem:[#allocation5 + $0x38] sm:$0xff]  ;;  %v48_v10 = vld [vmem:[#allocation5 + $0x30] sm:$0xff]  ;;  %v47_v11 = vld [vmem:[#allocation5 + $0x28] sm:$0xff]  ;;  %s252_s26 = scalar_lea.vmem %s143_s25, 128  ;;  %p257_p11 = scmp.lt.s32.totalorder %s143_s25, %s143_s25 }
  0x1e   :  { %173 = vmatpush3.msra.mxu0 %v56_v2  ;;  %v46_v12 = vld [vmem:[#allocation5 + $0x20] sm:$0xff]  ;;  %v45_v13 = vld [vmem:[#allocation5 + $0x18] sm:$0xff]  ;;  %v44_v14 = vld [vmem:[#allocation5 + $0x10] sm:$0xff]  ;;  %p253_p10 = scmp.ne.s32.totalorder %s143_s25, %s252_s26  ;;  %p258_p12 = scmp.lt.s32.totalorder %s252_s26, %s252_s26 }
  0x1f   :  { %174 = vmatprep.subr.mxu0 %v282_v0  ;;  %v43_v15 = vld [vmem:[#allocation5 + $0x8] sm:$0xff]  ;;  %v42_v16 = vld [vmem:[#allocation5] sm:$0xff]  ;;  %v41_v17 = vld [vmem:[#allocation2] sm:$0xff] }
  0x20   :  { %175 = vmatpush3.msra.mxu0 %v55_v3  ;;  %v152_v18 = vld [vmem:[%s319_s2] ss:$0 sm:$0xff]  ;;  %p259_p13 = por %p258_p12, %p257_p11 }
  0x21   :  { %176 = vmatprep.subr.mxu0 %v282_v0 }
  0x22   :  { %177 = vmatpush3.msra.mxu0 %v54_v4  ;;  %p260_p0 = pnand %p259_p13, %p253_p10 }
  0x23   :  { %178 = vmatprep.subr.mxu0 %v282_v0 }
  0x24   :  { %179 = vmatpush3.msra.mxu0 %v53_v5 }
  0x25   :  { %180 = vmatprep.subr.mxu0 %v282_v0 }
  0x26   :  { %181 = vmatpush3.msra.mxu0 %v52_v6 }
  0x27   :  { %182 = vmatprep.subr.mxu0 %v282_v0 }
  0x28   :  { %183 = vmatpush3.msra.mxu0 %v51_v7 }
  0x29   :  { %184 = vmatprep.subr.mxu0 %v282_v0 }
  0x2a   :  { %185 = vmatpush3.msra.mxu0 %v50_v8 }
  0x2b   :  { %186 = vmatprep.subr.mxu0 %v282_v0 }
  0x2c   :  { %187 = vmatpush3.msra.mxu0 %v49_v9 }
  0x2d   :  { %188 = vmatprep.subr.mxu0 %v282_v0 }
  0x2e   :  { %189 = vmatpush3.msra.mxu0 %v48_v10 }
  0x2f   :  { %190 = vmatprep.subr.mxu0 %v282_v0 }
  0x30   :  { %191 = vmatpush3.msra.mxu0 %v47_v11 }
  0x31   :  { %192 = vmatprep.subr.mxu0 %v282_v0 }
  0x32   :  { %193 = vmatpush3.msra.mxu0 %v46_v12 }
  0x33   :  { %194 = vmatprep.subr.mxu0 %v282_v0 }
  0x34   :  { %195 = vmatpush3.msra.mxu0 %v45_v13 }
  0x35   :  { %196 = vmatprep.subr.mxu0 %v282_v0 }
  0x36   :  { %197 = vmatpush3.msra.mxu0 %v44_v14 }
  0x37   :  { %198 = vmatprep.subr.mxu0 %v282_v0 }
  0x38   :  { %199 = vmatpush3.msra.mxu0 %v43_v15 }
  0x39   :  { %200 = vmatprep.subr.mxu0 %v282_v0 }
  0x3a   :  { %201 = vmatpush3.msra.mxu0 %v42_v16 }
  0x3b   :  { %203 = vmatmul.mubr.f32.vlgmr.msra.gmra.mxu0 %v41_v17 }
  0xfb   :  { %v131_v19 = vpop.f32.mrf.mxu0 }
  0xfc   :  { %v132_v20 = vadd.f32 %v152_v18, %v131_v19 }
  0xfd   :  { %v204_v21 = vpop.f32.mrf.mxu0 }
  0xfe   :  { %135 = vst [vmem:[#allocation7] sm:$0xff] %v132_v20 }
  0xff   :  { %263 = shalt.err (!%p260_p0)
}
 0x100   :  { %145 = dma.vmem_to_hbm [thread:$0]  %s143_s25, 128, %s320_s3, [#allocation4]  }
 0x101   :  { %276 = dma.done.wait [#allocation4], 128  }
 0x102   :  { %277 = vsyncadd [#allocation4], 4294967168 }
 0x103   :  { %149 = vsyncpa [#allocation3], 1 }
 0x104   :  { %150 = vsyncpa [#allocation6], 1 }
 0x105   :  { %151 = vsyncpa [#allocation4], 1 }

</bundles_post_ra>
